<compile_context>
chip_gen: v7x
topology: tpu7x:2x2x1
jax: 0.10.0
libtpu: 0.0.40
codegen_flags: <defaults>
</compile_context>

<pallas_src>
import functools

import jax
import jax.numpy as jnp
from jax.experimental import pallas as pl
from jax.experimental.pallas import tpu as pltpu

_LANES = 128
_SUB = 8
_TR_MAX = 256  # 256*128 = 32768 elems/coord/tile (~2.9 MB inputs per step)


def _loss_kernel(pred_ref, target_ref, weight_ref, anchors_ref, out_ref, acc_ref,
                 *, beta, loss_weight, n):
    s = pl.program_id(1)

    @pl.when(s == 0)
    def _():
        acc_ref[...] = jnp.zeros_like(acc_ref)

    p = pred_ref[...]     # (6, TR, 128) f32, coordinate-planar
    t = target_ref[...]   # (6, TR, 128)
    w = weight_ref[...]   # (6, TR, 128)
    a = anchors_ref[...]  # (4, TR, 128)

    # ---- smooth L1 over all 6 coords (elementwise, weighted) ----
    diff = jnp.abs(p - t)
    sl1 = jnp.where(diff < beta, diff * diff * (0.5 / beta), diff - 0.5 * beta)
    bbox = jnp.sum(sl1 * w, axis=0)                      # (TR, 128), pure VPU adds

    # ---- sqrt_loss (center term) on coords 0:4 ----
    e2 = jnp.exp(-p[2])
    e3 = jnp.exp(-p[3])
    dx = (p[0] - t[0]) * e2
    dy = (p[1] - t[1]) * e3
    center = jnp.sqrt(dx * dx + dy * dy)                 # (TR, 128)
    w_center = (w[0] + w[1] + w[2] + w[3]) * 0.25

    # ---- decrease_one_loss (area term) on coords 2:6 ----
    pr = (a[2] - a[0]) / (a[3] - a[1])
    r = e3 / e2                                          # exp(p2 - p3), exp reuse
    pre = (pr * r) ** 2                                  # pr^2 * exp(2p2 - 2p3)
    ratio = (pre + 4.0 * p[5] * p[5]) / (1.0 + 4.0 * p[4] * p[4] * pre)
    lg = 0.5 * jnp.log(ratio)                            # log(k) up to sign; squared below
    area = ((p[4] * p[5] - t[4] * t[5]) ** 2 + lg * lg) * 0.5
    w_area = (w[2] + w[3] + w[4] + w[5]) * 0.25

    nf = float(n)
    c_bbox = 0.8 * loss_weight / (nf * 6.0)
    c_term = 0.1 * loss_weight / nf
    acc_ref[...] += (c_bbox * bbox
                     + c_term * (center * w_center)
                     + c_term * (area * w_area))

    @pl.when(s == pl.num_programs(1) - 1)
    def _():
        total = jnp.sum(acc_ref[...])
        out_ref[...] = jnp.full(out_ref.shape, total, dtype=out_ref.dtype)


def smooth_l1_improved_loss(pred, target, weight, anchors,
                            beta=1.0, loss_weight=1.0):
    """pred/target/weight: (N, 6), anchors: (N, 4). Returns scalar ('mean')."""
    n = pred.shape[0]

    # ---- choose tiling: R rows of 128 lanes, R = n_slices * steps * tr ----
    r_needed = max(1, -(-n // _LANES))
    r8 = -(-r_needed // _SUB) * _SUB                  # multiple of 8 (dense vregs)
    if r8 <= _TR_MAX:
        tr, n_slices, steps = r8, 1, 1
    else:
        tr = _TR_MAX
        n_slices = 2                                  # both TCs on v7x; serial elsewhere
        steps = -(-r8 // (tr * n_slices))
    R = tr * n_slices * steps
    n_pad = R * _LANES

    def planar(x, fill_row):
        # (N, C) -> (C, R, 128); single fused relayout in XLA.
        x = x.astype(jnp.float32)
        c = x.shape[1]
        if n_pad > n:
            pad = jnp.broadcast_to(jnp.asarray(fill_row, jnp.float32),
                                   (n_pad - n, c))
            x = jnp.concatenate([x, pad], axis=0)
        return x.T.reshape(c, R, _LANES)

    p = planar(pred,    (0.0,) * 6)
    t = planar(target,  (0.0,) * 6)
    w = planar(weight,  (0.0,) * 6)                   # zero weight masks padding
    a = planar(anchors, (0.0, 0.0, 1.0, 1.0))         # keep pr finite in padding

    kernel = functools.partial(_loss_kernel, beta=float(beta),
                               loss_weight=float(loss_weight), n=n)
    in_map = lambda c, s: (0, c * steps + s, 0)

    out = pl.pallas_call(
        kernel,
        grid=(n_slices, steps),
        in_specs=[
            pl.BlockSpec((6, tr, _LANES), in_map),
            pl.BlockSpec((6, tr, _LANES), in_map),
            pl.BlockSpec((6, tr, _LANES), in_map),
            pl.BlockSpec((4, tr, _LANES), in_map),
        ],
        out_specs=pl.BlockSpec((1, _SUB, _LANES), lambda c, s: (c, 0, 0)),
        out_shape=jax.ShapeDtypeStruct((n_slices, _SUB, _LANES), jnp.float32),
        scratch_shapes=[pltpu.VMEM((tr, _LANES), jnp.float32)],
        compiler_params=pltpu.CompilerParams(
            dimension_semantics=("parallel", "arbitrary")),
    )(p, t, w, a)
    return jnp.sum(out[:, 0, 0])


def _reference(pred, target, weight, anchors, beta=1.0, loss_weight=1.0):
    """Pure-JAX reference mirroring the PyTorch module (reduction='mean')."""
    pred = pred.astype(jnp.float32)
    target = target.astype(jnp.float32)
    weight = weight.astype(jnp.float32)
    anchors = anchors.astype(jnp.float32)

    diff = jnp.abs(pred - target)
    sl1 = jnp.where(diff < beta, 0.5 * diff * diff / beta, diff - 0.5 * beta)
    loss_bbox = 0.8 * loss_weight * jnp.mean(sl1 * weight)

    p = pred[:, 0:4]
    tt = target[:, 0:4]
    center = jnp.sqrt(jnp.exp(-2 * p[:, 2]) * (p[:, 0] - tt[:, 0]) ** 2 +
                      jnp.exp(-2 * p[:, 3]) * (p[:, 1] - tt[:, 1]) ** 2)
    loss_center = 0.1 * loss_weight * jnp.mean(
        center * jnp.mean(weight[:, 0:4], axis=1))

    p = pred[:, 2:6]
    tt = target[:, 2:6]
    pr = (anchors[:, 2] - anchors[:, 0]) / (anchors[:, 3] - anchors[:, 1])
    e = jnp.exp(2 * p[:, 0] - 2 * p[:, 1])
    q = jnp.sqrt((pr ** 2 * e + 4 * p[:, 3] ** 2) /
                 (1 + 4 * p[:, 2] ** 2 * pr ** 2 * e))
    k = jnp.where(q >= 1, q, 1 / q)
    area = ((p[:, 2] * p[:, 3] - tt[:, 2] * tt[:, 3]) ** 2 + jnp.log(k) ** 2) / 2
    loss_area = 0.1 * loss_weight * jnp.mean(
        area * jnp.mean(weight[:, 2:6], axis=1))

    return loss_bbox + loss_center + loss_area


def _make_inputs(key, n):
    k1, k2, k3, k4, k5, k6, k7 = jax.random.split(key, 7)
    pred = 0.5 * jax.random.normal(k1, (n, 6), dtype=jnp.float32)
    target = 0.5 * jax.random.normal(k2, (n, 6), dtype=jnp.float32)
    weight = jax.random.uniform(k3, (n, 6), dtype=jnp.float32,
                                minval=0.5, maxval=1.5)
    x1 = jax.random.uniform(k4, (n,), dtype=jnp.float32, minval=0.0, maxval=10.0)
    y1 = jax.random.uniform(k5, (n,), dtype=jnp.float32, minval=0.0, maxval=10.0)
    bw = jax.random.uniform(k6, (n,), dtype=jnp.float32, minval=1.0, maxval=5.0)
    bh = jax.random.uniform(k7, (n,), dtype=jnp.float32, minval=1.0, maxval=5.0)
    anchors = jnp.stack([x1, y1, x1 + bw, y1 + bh], axis=1)
    return pred, target, weight, anchors


if __name__ == "__main__":
    key = jax.random.PRNGKey(0)
    k_small, k_big = jax.random.split(key)

    # small shape: single tile, single slice
    pred, target, weight, anchors = _make_inputs(k_small, 128)
    out = smooth_l1_improved_loss(pred, target, weight, anchors,
                                  beta=1.0, loss_weight=1.0)
    out = jax.block_until_ready(out)
    ref = _reference(pred, target, weight, anchors, beta=1.0, loss_weight=1.0)
    assert jnp.allclose(out, ref, rtol=1e-4, atol=1e-5), (out, ref)

    # larger shape: exercises the tiled, multi-step, 2-slice (megacore) path
    pred, target, weight, anchors = _make_inputs(k_big, 40000)
    out2 = smooth_l1_improved_loss(pred, target, weight, anchors,
                                   beta=1.0, loss_weight=1.0)
    out2 = jax.block_until_ready(out2)
    ref2 = _reference(pred, target, weight, anchors, beta=1.0, loss_weight=1.0)
    assert jnp.allclose(out2, ref2, rtol=1e-4, atol=1e-5), (out2, ref2)

    print("KERNEL_OK")
</pallas_src>

<mosaic_0001>
module attributes {stable_mosaic.version = 11 : i64} {
  func.func @_loss_kernel(%arg0: i32, %arg1: i32, %arg2: memref<6x8x128xf32, #tpu.memory_space<vmem>>, %arg3: memref<6x8x128xf32, #tpu.memory_space<vmem>>, %arg4: memref<6x8x128xf32, #tpu.memory_space<vmem>>, %arg5: memref<4x8x128xf32, #tpu.memory_space<vmem>>, %arg6: memref<1x8x128xf32, #tpu.memory_space<vmem>>, %arg7: memref<8x128xf32, #tpu.memory_space<vmem>>) attributes {dimension_semantics = [#tpu.dimension_semantics<parallel>, #tpu.dimension_semantics<arbitrary>], iteration_bounds = array<i64: 1, 1>, scalar_prefetch = 0 : i64, scratch_operands = 1 : i64, tpu.core_type = #tpu.core_type<tc>, window_params = [{transform_indices = @transform_0, window_bounds = array<i64: 6, 8, 128>}, {transform_indices = @transform_1, window_bounds = array<i64: 6, 8, 128>}, {transform_indices = @transform_2, window_bounds = array<i64: 6, 8, 128>}, {transform_indices = @transform_3, window_bounds = array<i64: 4, 8, 128>}, {transform_indices = @transform_4, window_bounds = array<i64: 1, 8, 128>}]} {
    %c0_i32 = arith.constant 0 : i32
    %0 = arith.cmpi eq, %arg1, %c0_i32 : i32
    %1 = arith.extui %0 : i1 to i32
    %c0_i32_0 = arith.constant 0 : i32
    %2 = arith.cmpi ne, %1, %c0_i32_0 : i32
    scf.if %2 {
      %cst_33 = arith.constant 0.000000e+00 : f32
      %139 = vector.broadcast %cst_33 : f32 to vector<8x128xf32>
      %c0_34 = arith.constant 0 : index
      %c0_35 = arith.constant 0 : index
      %140 = vector.load %arg7[%c0_34, %c0_35] : memref<8x128xf32, #tpu.memory_space<vmem>>, vector<8x128xf32>
      tpu.vector_store %arg7[%c0_34, %c0_35], %139 {strides = array<i32>} : memref<8x128xf32, #tpu.memory_space<vmem>>, vector<8x128xf32>,
    } else {
    }
    %c0 = arith.constant 0 : index
    %c0_1 = arith.constant 0 : index
    %c0_2 = arith.constant 0 : index
    %3 = vector.load %arg2[%c0, %c0_1, %c0_2] : memref<6x8x128xf32, #tpu.memory_space<vmem>>, vector<6x8x128xf32>
    %c0_3 = arith.constant 0 : index
    %c0_4 = arith.constant 0 : index
    %c0_5 = arith.constant 0 : index
    %4 = vector.load %arg3[%c0_3, %c0_4, %c0_5] : memref<6x8x128xf32, #tpu.memory_space<vmem>>, vector<6x8x128xf32>
    %c0_6 = arith.constant 0 : index
    %c0_7 = arith.constant 0 : index
    %c0_8 = arith.constant 0 : index
    %5 = vector.load %arg4[%c0_6, %c0_7, %c0_8] : memref<6x8x128xf32, #tpu.memory_space<vmem>>, vector<6x8x128xf32>
    %c0_9 = arith.constant 0 : index
    %c0_10 = arith.constant 0 : index
    %c0_11 = arith.constant 0 : index
    %6 = vector.load %arg5[%c0_9, %c0_10, %c0_11] : memref<4x8x128xf32, #tpu.memory_space<vmem>>, vector<4x8x128xf32>
    %7 = arith.subf %3, %4 : vector<6x8x128xf32>
    %8 = math.absf %7 : vector<6x8x128xf32>
    %cst = arith.constant 1.000000e+00 : f32
    %9 = vector.broadcast %cst : f32 to vector<6x8x128xf32>
    %10 = arith.cmpf olt, %8, %9 : vector<6x8x128xf32>
    %11 = arith.mulf %8, %8 : vector<6x8x128xf32>
    %cst_12 = arith.constant 5.000000e-01 : f32
    %12 = vector.broadcast %cst_12 : f32 to vector<6x8x128xf32>
    %13 = arith.mulf %11, %12 : vector<6x8x128xf32>
    %cst_13 = arith.constant 5.000000e-01 : f32
    %14 = vector.broadcast %cst_13 : f32 to vector<6x8x128xf32>
    %15 = arith.subf %8, %14 : vector<6x8x128xf32>
    %16 = arith.select %10, %13, %15 : vector<6x8x128xi1>, vector<6x8x128xf32>
    %17 = arith.mulf %16, %5 : vector<6x8x128xf32>
    %cst_14 = arith.constant dense<0.000000e+00> : vector<8x128xf32>
    %18 = vector.multi_reduction <add>, %17, %cst_14 [0] : vector<6x8x128xf32> to vector<8x128xf32>
    %19 = vector.extract_strided_slice %3 {offsets = [2, 0, 0], sizes = [1, 8, 128], strides = [1, 1, 1]} : vector<6x8x128xf32> to vector<1x8x128xf32>
    %20 = vector.shape_cast %19 : vector<1x8x128xf32> to vector<8x128xf32>
    %cst_15 = arith.constant 0.000000e+00 : f32
    %21 = vector.broadcast %cst_15 : f32 to vector<8x128xf32>
    %22 = arith.subf %21, %20 : vector<8x128xf32>
    %23 = math.exp %22 : vector<8x128xf32>
    %24 = vector.extract_strided_slice %3 {offsets = [3, 0, 0], sizes = [1, 8, 128], strides = [1, 1, 1]} : vector<6x8x128xf32> to vector<1x8x128xf32>
    %25 = vector.shape_cast %24 : vector<1x8x128xf32> to vector<8x128xf32>
    %cst_16 = arith.constant 0.000000e+00 : f32
    %26 = vector.broadcast %cst_16 : f32 to vector<8x128xf32>
    %27 = arith.subf %26, %25 : vector<8x128xf32>
    %28 = math.exp %27 : vector<8x128xf32>
    %29 = vector.extract_strided_slice %3 {offsets = [0, 0, 0], sizes = [1, 8, 128], strides = [1, 1, 1]} : vector<6x8x128xf32> to vector<1x8x128xf32>
    %30 = vector.shape_cast %29 : vector<1x8x128xf32> to vector<8x128xf32>
    %31 = vector.extract_strided_slice %4 {offsets = [0, 0, 0], sizes = [1, 8, 128], strides = [1, 1, 1]} : vector<6x8x128xf32> to vector<1x8x128xf32>
    %32 = vector.shape_cast %31 : vector<1x8x128xf32> to vector<8x128xf32>
    %33 = arith.subf %30, %32 : vector<8x128xf32>
    %34 = arith.mulf %33, %23 : vector<8x128xf32>
    %35 = vector.extract_strided_slice %3 {offsets = [1, 0, 0], sizes = [1, 8, 128], strides = [1, 1, 1]} : vector<6x8x128xf32> to vector<1x8x128xf32>
    %36 = vector.shape_cast %35 : vector<1x8x128xf32> to vector<8x128xf32>
    %37 = vector.extract_strided_slice %4 {offsets = [1, 0, 0], sizes = [1, 8, 128], strides = [1, 1, 1]} : vector<6x8x128xf32> to vector<1x8x128xf32>
    %38 = vector.shape_cast %37 : vector<1x8x128xf32> to vector<8x128xf32>
    %39 = arith.subf %36, %38 : vector<8x128xf32>
    %40 = arith.mulf %39, %28 : vector<8x128xf32>
    %41 = arith.mulf %34, %34 : vector<8x128xf32>
    %42 = arith.mulf %40, %40 : vector<8x128xf32>
    %43 = arith.addf %41, %42 : vector<8x128xf32>
    %44 = math.sqrt %43 : vector<8x128xf32>
    %45 = vector.extract_strided_slice %5 {offsets = [0, 0, 0], sizes = [1, 8, 128], strides = [1, 1, 1]} : vector<6x8x128xf32> to vector<1x8x128xf32>
    %46 = vector.shape_cast %45 : vector<1x8x128xf32> to vector<8x128xf32>
    %47 = vector.extract_strided_slice %5 {offsets = [1, 0, 0], sizes = [1, 8, 128], strides = [1, 1, 1]} : vector<6x8x128xf32> to vector<1x8x128xf32>
    %48 = vector.shape_cast %47 : vector<1x8x128xf32> to vector<8x128xf32>
    %49 = arith.addf %46, %48 : vector<8x128xf32>
    %50 = vector.extract_strided_slice %5 {offsets = [2, 0, 0], sizes = [1, 8, 128], strides = [1, 1, 1]} : vector<6x8x128xf32> to vector<1x8x128xf32>
    %51 = vector.shape_cast %50 : vector<1x8x128xf32> to vector<8x128xf32>
    %52 = arith.addf %49, %51 : vector<8x128xf32>
    %53 = vector.extract_strided_slice %5 {offsets = [3, 0, 0], sizes = [1, 8, 128], strides = [1, 1, 1]} : vector<6x8x128xf32> to vector<1x8x128xf32>
    %54 = vector.shape_cast %53 : vector<1x8x128xf32> to vector<8x128xf32>
    %55 = arith.addf %52, %54 : vector<8x128xf32>
    %cst_17 = arith.constant 2.500000e-01 : f32
    %56 = vector.broadcast %cst_17 : f32 to vector<8x128xf32>
    %57 = arith.mulf %55, %56 : vector<8x128xf32>
    %58 = vector.extract_strided_slice %6 {offsets = [2, 0, 0], sizes = [1, 8, 128], strides = [1, 1, 1]} : vector<4x8x128xf32> to vector<1x8x128xf32>
    %59 = vector.shape_cast %58 : vector<1x8x128xf32> to vector<8x128xf32>
    %60 = vector.extract_strided_slice %6 {offsets = [0, 0, 0], sizes = [1, 8, 128], strides = [1, 1, 1]} : vector<4x8x128xf32> to vector<1x8x128xf32>
    %61 = vector.shape_cast %60 : vector<1x8x128xf32> to vector<8x128xf32>
    %62 = arith.subf %59, %61 : vector<8x128xf32>
    %63 = vector.extract_strided_slice %6 {offsets = [3, 0, 0], sizes = [1, 8, 128], strides = [1, 1, 1]} : vector<4x8x128xf32> to vector<1x8x128xf32>
    %64 = vector.shape_cast %63 : vector<1x8x128xf32> to vector<8x128xf32>
    %65 = vector.extract_strided_slice %6 {offsets = [1, 0, 0], sizes = [1, 8, 128], strides = [1, 1, 1]} : vector<4x8x128xf32> to vector<1x8x128xf32>
    %66 = vector.shape_cast %65 : vector<1x8x128xf32> to vector<8x128xf32>
    %67 = arith.subf %64, %66 : vector<8x128xf32>
    %68 = arith.divf %62, %67 : vector<8x128xf32>
    %69 = arith.divf %28, %23 : vector<8x128xf32>
    %70 = arith.mulf %68, %69 : vector<8x128xf32>
    %71 = arith.mulf %70, %70 : vector<8x128xf32>
    %72 = vector.extract_strided_slice %3 {offsets = [5, 0, 0], sizes = [1, 8, 128], strides = [1, 1, 1]} : vector<6x8x128xf32> to vector<1x8x128xf32>
    %73 = vector.shape_cast %72 : vector<1x8x128xf32> to vector<8x128xf32>
    %cst_18 = arith.constant 4.000000e+00 : f32
    %74 = vector.broadcast %cst_18 : f32 to vector<8x128xf32>
    %75 = arith.mulf %74, %73 : vector<8x128xf32>
    %76 = vector.extract_strided_slice %3 {offsets = [5, 0, 0], sizes = [1, 8, 128], strides = [1, 1, 1]} : vector<6x8x128xf32> to vector<1x8x128xf32>
    %77 = vector.shape_cast %76 : vector<1x8x128xf32> to vector<8x128xf32>
    %78 = arith.mulf %75, %77 : vector<8x128xf32>
    %79 = arith.addf %71, %78 : vector<8x128xf32>
    %80 = vector.extract_strided_slice %3 {offsets = [4, 0, 0], sizes = [1, 8, 128], strides = [1, 1, 1]} : vector<6x8x128xf32> to vector<1x8x128xf32>
    %81 = vector.shape_cast %80 : vector<1x8x128xf32> to vector<8x128xf32>
    %cst_19 = arith.constant 4.000000e+00 : f32
    %82 = vector.broadcast %cst_19 : f32 to vector<8x128xf32>
    %83 = arith.mulf %82, %81 : vector<8x128xf32>
    %84 = vector.extract_strided_slice %3 {offsets = [4, 0, 0], sizes = [1, 8, 128], strides = [1, 1, 1]} : vector<6x8x128xf32> to vector<1x8x128xf32>
    %85 = vector.shape_cast %84 : vector<1x8x128xf32> to vector<8x128xf32>
    %86 = arith.mulf %83, %85 : vector<8x128xf32>
    %87 = arith.mulf %86, %71 : vector<8x128xf32>
    %cst_20 = arith.constant 1.000000e+00 : f32
    %88 = vector.broadcast %cst_20 : f32 to vector<8x128xf32>
    %89 = arith.addf %88, %87 : vector<8x128xf32>
    %90 = arith.divf %79, %89 : vector<8x128xf32>
    %91 = math.log %90 : vector<8x128xf32>
    %cst_21 = arith.constant 5.000000e-01 : f32
    %92 = vector.broadcast %cst_21 : f32 to vector<8x128xf32>
    %93 = arith.mulf %92, %91 : vector<8x128xf32>
    %94 = vector.extract_strided_slice %3 {offsets = [4, 0, 0], sizes = [1, 8, 128], strides = [1, 1, 1]} : vector<6x8x128xf32> to vector<1x8x128xf32>
    %95 = vector.shape_cast %94 : vector<1x8x128xf32> to vector<8x128xf32>
    %96 = vector.extract_strided_slice %3 {offsets = [5, 0, 0], sizes = [1, 8, 128], strides = [1, 1, 1]} : vector<6x8x128xf32> to vector<1x8x128xf32>
    %97 = vector.shape_cast %96 : vector<1x8x128xf32> to vector<8x128xf32>
    %98 = arith.mulf %95, %97 : vector<8x128xf32>
    %99 = vector.extract_strided_slice %4 {offsets = [4, 0, 0], sizes = [1, 8, 128], strides = [1, 1, 1]} : vector<6x8x128xf32> to vector<1x8x128xf32>
    %100 = vector.shape_cast %99 : vector<1x8x128xf32> to vector<8x128xf32>
    %101 = vector.extract_strided_slice %4 {offsets = [5, 0, 0], sizes = [1, 8, 128], strides = [1, 1, 1]} : vector<6x8x128xf32> to vector<1x8x128xf32>
    %102 = vector.shape_cast %101 : vector<1x8x128xf32> to vector<8x128xf32>
    %103 = arith.mulf %100, %102 : vector<8x128xf32>
    %104 = arith.subf %98, %103 : vector<8x128xf32>
    %105 = arith.mulf %104, %104 : vector<8x128xf32>
    %106 = arith.mulf %93, %93 : vector<8x128xf32>
    %107 = arith.addf %105, %106 : vector<8x128xf32>
    %cst_22 = arith.constant 5.000000e-01 : f32
    %108 = vector.broadcast %cst_22 : f32 to vector<8x128xf32>
    %109 = arith.mulf %107, %108 : vector<8x128xf32>
    %110 = vector.extract_strided_slice %5 {offsets = [2, 0, 0], sizes = [1, 8, 128], strides = [1, 1, 1]} : vector<6x8x128xf32> to vector<1x8x128xf32>
    %111 = vector.shape_cast %110 : vector<1x8x128xf32> to vector<8x128xf32>
    %112 = vector.extract_strided_slice %5 {offsets = [3, 0, 0], sizes = [1, 8, 128], strides = [1, 1, 1]} : vector<6x8x128xf32> to vector<1x8x128xf32>
    %113 = vector.shape_cast %112 : vector<1x8x128xf32> to vector<8x128xf32>
    %114 = arith.addf %111, %113 : vector<8x128xf32>
    %115 = vector.extract_strided_slice %5 {offsets = [4, 0, 0], sizes = [1, 8, 128], strides = [1, 1, 1]} : vector<6x8x128xf32> to vector<1x8x128xf32>
    %116 = vector.shape_cast %115 : vector<1x8x128xf32> to vector<8x128xf32>
    %117 = arith.addf %114, %116 : vector<8x128xf32>
    %118 = vector.extract_strided_slice %5 {offsets = [5, 0, 0], sizes = [1, 8, 128], strides = [1, 1, 1]} : vector<6x8x128xf32> to vector<1x8x128xf32>
    %119 = vector.shape_cast %118 : vector<1x8x128xf32> to vector<8x128xf32>
    %120 = arith.addf %117, %119 : vector<8x128xf32>
    %cst_23 = arith.constant 2.500000e-01 : f32
    %121 = vector.broadcast %cst_23 : f32 to vector<8x128xf32>
    %122 = arith.mulf %120, %121 : vector<8x128xf32>
    %c0_24 = arith.constant 0 : index
    %c0_25 = arith.constant 0 : index
    %123 = vector.load %arg7[%c0_24, %c0_25] : memref<8x128xf32, #tpu.memory_space<vmem>>, vector<8x128xf32>
    %cst_26 = arith.constant 0.00104166672 : f32
    %124 = vector.broadcast %cst_26 : f32 to vector<8x128xf32>
    %125 = arith.mulf %124, %18 : vector<8x128xf32>
    %126 = arith.mulf %44, %57 : vector<8x128xf32>
    %cst_27 = arith.constant 7.812500e-04 : f32
    %127 = vector.broadcast %cst_27 : f32 to vector<8x128xf32>
    %128 = arith.mulf %127, %126 : vector<8x128xf32>
    %129 = arith.addf %125, %128 : vector<8x128xf32>
    %130 = arith.mulf %109, %122 : vector<8x128xf32>
    %cst_28 = arith.constant 7.812500e-04 : f32
    %131 = vector.broadcast %cst_28 : f32 to vector<8x128xf32>
    %132 = arith.mulf %131, %130 : vector<8x128xf32>
    %133 = arith.addf %129, %132 : vector<8x128xf32>
    %134 = arith.addf %123, %133 : vector<8x128xf32>
    %c0_29 = arith.constant 0 : index
    %c0_30 = arith.constant 0 : index
    %135 = vector.load %arg7[%c0_29, %c0_30] : memref<8x128xf32, #tpu.memory_space<vmem>>, vector<8x128xf32>
    tpu.vector_store %arg7[%c0_29, %c0_30], %134 {strides = array<i32>} : memref<8x128xf32, #tpu.memory_space<vmem>>, vector<8x128xf32>,
    %c0_i32_31 = arith.constant 0 : i32
    %136 = arith.cmpi eq, %arg1, %c0_i32_31 : i32
    %137 = arith.extui %136 : i1 to i32
    %c0_i32_32 = arith.constant 0 : i32
    %138 = arith.cmpi ne, %137, %c0_i32_32 : i32
    scf.if %138 {
      %c0_33 = arith.constant 0 : index
      %c0_34 = arith.constant 0 : index
      %139 = vector.load %arg7[%c0_33, %c0_34] : memref<8x128xf32, #tpu.memory_space<vmem>>, vector<8x128xf32>
      %140 = vector.shape_cast %139 : vector<8x128xf32> to vector<1x8x128xf32>
      %cst_35 = arith.constant dense<0.000000e+00> : vector<1xf32>
      %141 = vector.multi_reduction <add>, %140, %cst_35 [1, 2] : vector<1x8x128xf32> to vector<1xf32>
      %142 = vector.shape_cast %141 : vector<1xf32> to vector<1x1x1xf32>
      %143 = vector.extract %142[0, 0, 0] : f32 from vector<1x1x1xf32>
      %144 = vector.broadcast %143 : f32 to vector<1x8x128xf32>
      %c0_36 = arith.constant 0 : index
      %c0_37 = arith.constant 0 : index
      %c0_38 = arith.constant 0 : index
      %145 = vector.load %arg6[%c0_36, %c0_37, %c0_38] : memref<1x8x128xf32, #tpu.memory_space<vmem>>, vector<1x8x128xf32>
      tpu.vector_store %arg6[%c0_36, %c0_37, %c0_38], %144 {strides = array<i32>} : memref<1x8x128xf32, #tpu.memory_space<vmem>>, vector<1x8x128xf32>,
    } else {
    }
    return
  }
  func.func @transform_0(%arg0: i32, %arg1: i32) -> (i32, i32, i32) {
    %c1_i32 = arith.constant 1 : i32
    %0 = arith.muli %arg0, %c1_i32 : i32
    %1 = arith.addi %0, %arg1 : i32
    %c0_i32 = arith.constant 0 : i32
    %c0_i32_0 = arith.constant 0 : i32
    %c0_i32_1 = arith.constant 0 : i32
    return %c0_i32, %1, %c0_i32_0 : i32, i32, i32
  }
  func.func @transform_1(%arg0: i32, %arg1: i32) -> (i32, i32, i32) {
    %c1_i32 = arith.constant 1 : i32
    %0 = arith.muli %arg0, %c1_i32 : i32
    %1 = arith.addi %0, %arg1 : i32
    %c0_i32 = arith.constant 0 : i32
    %c0_i32_0 = arith.constant 0 : i32
    %c0_i32_1 = arith.constant 0 : i32
    return %c0_i32, %1, %c0_i32_0 : i32, i32, i32
  }
  func.func @transform_2(%arg0: i32, %arg1: i32) -> (i32, i32, i32) {
    %c1_i32 = arith.constant 1 : i32
    %0 = arith.muli %arg0, %c1_i32 : i32
    %1 = arith.addi %0, %arg1 : i32
    %c0_i32 = arith.constant 0 : i32
    %c0_i32_0 = arith.constant 0 : i32
    %c0_i32_1 = arith.constant 0 : i32
    return %c0_i32, %1, %c0_i32_0 : i32, i32, i32
  }
  func.func @transform_3(%arg0: i32, %arg1: i32) -> (i32, i32, i32) {
    %c1_i32 = arith.constant 1 : i32
    %0 = arith.muli %arg0, %c1_i32 : i32
    %1 = arith.addi %0, %arg1 : i32
    %c0_i32 = arith.constant 0 : i32
    %c0_i32_0 = arith.constant 0 : i32
    %c0_i32_1 = arith.constant 0 : i32
    return %c0_i32, %1, %c0_i32_0 : i32, i32, i32
  }
  func.func @transform_4(%arg0: i32, %arg1: i32) -> (i32, i32, i32) {
    %c0_i32 = arith.constant 0 : i32
    %c0_i32_0 = arith.constant 0 : i32
    %c0_i32_1 = arith.constant 0 : i32
    return %arg0, %c0_i32, %c0_i32_0 : i32, i32, i32
  }
}

</mosaic_0001>

<bundles_post_ra>
// kernel: tpu_custom_call.1
= control target key start
LH: loop header
LB: loop body
LE: loop exit
PB: predicated region body
PF: predicated region fallthrough
CT: control target
= control target key end

     0   :  { %9 = vsyncpa [#allocation4], 0  ;;  %s553_s0 = inlined_call_operand.hbm [shape: f32[6,8,128], index: 0, kind: input, shape index: {}]   ;;  %s554_s1 = inlined_call_operand.hbm [shape: f32[6,8,128], index: 1, kind: input, shape index: {}]   ;;  %s555_s2 = inlined_call_operand.hbm [shape: f32[6,8,128], index: 2, kind: input, shape index: {}]   ;;  %s556_s3 = inlined_call_operand.hbm [shape: f32[4,8,128], index: 3, kind: input, shape index: {}]   ;;  %s557_s4 = inlined_call_operand.hbm [shape: f32[1,8,128], index: 4, kind: output, shape index: {}]  }
   0x1   :  { %10 = vsyncpa [#allocation7], 0 }
   0x2   :  { %11 = vsyncpa [#allocation10], 0 }
   0x3   :  { %12 = vsyncpa [#allocation5], 0  ;;  %s411_s15 = smov [#allocation6]   ;;  %s412_s17 = smov [#allocation3]  }
   0x4   :  { %s36_s16 = sshll.u32 %s411_s15, 4  ;;  %s21_s18 = sshll.u32 %s412_s17, 4  ;;  %s37_s16 = int_to_ptr.vmem [resolvable:$true] %s36_s16  ;;  %s443_s18 = int_to_ptr.vmem [resolvable:$true] %s21_s18 }
   0x5   :  { %s293_s21 = scalar_lea.hbm %s554_s1, 768 }
   0x6   :  { %p294_p0 = scmp.ne.s32.totalorder %s554_s1, %s293_s21  ;;  %p297_p1 = scmp.lt.u32.totalorder %s293_s21, %s554_s1 }
   0x8   :  { %p299_p2 = pnand %p297_p1, %p294_p0 }
   0xa   :  { %302 = shalt.err (!%p299_p2)
}
   0xb   :  { %s303_s26 = scalar_lea.vmem %s37_s16, 768  ;;  %p308_p4 = scmp.lt.s32.totalorder %s37_s16, %s37_s16 }
   0xc   :  { %p304_p3 = scmp.ne.s32.totalorder %s37_s16, %s303_s26  ;;  %p309_p5 = scmp.lt.s32.totalorder %s303_s26, %s303_s26 }
   0xe   :  { %p310_p6 = por %p309_p5, %p308_p4 }
  0x10   :  { %p311_p7 = pnand %p310_p6, %p304_p3 }
  0x12   :  { %314 = shalt.err (!%p311_p7)
}
  0x13   :  { %s413_s27 = smov 128   ;;  %s414_s28 = smov 8  }
  0x14   :  { %42 = dma.hbm_to_vmem [thread:$0]  %s554_s1, 768, %s37_s16, [#allocation7], %s413_s27, %s413_s27, %s414_s28  }
  0x15   :  { %s315_s7 = scalar_lea.hbm %s553_s0, 768 }
  0x16   :  { %p316_p8 = scmp.ne.s32.totalorder %s553_s0, %s315_s7  ;;  %p319_p9 = scmp.lt.u32.totalorder %s315_s7, %s553_s0 }
  0x18   :  { %p321_p10 = pnand %p319_p9, %p316_p8 }
  0x1a   :  { %324 = shalt.err (!%p321_p10)
}
  0x1b   :  { %s325_s12 = scalar_lea.vmem %s443_s18, 768  ;;  %p330_p12 = scmp.lt.s32.totalorder %s443_s18, %s443_s18 }
  0x1c   :  { %p326_p11 = scmp.ne.s32.totalorder %s443_s18, %s325_s12  ;;  %p331_p13 = scmp.lt.s32.totalorder %s325_s12, %s325_s12 }
  0x1e   :  { %p332_p0 = por %p331_p13, %p330_p12 }
  0x20   :  { %p333_p1 = pnand %p332_p0, %p326_p11 }
  0x22   :  { %336 = shalt.err (!%p333_p1)
}
  0x23   :  { %27 = dma.hbm_to_vmem [thread:$0]  %s553_s0, 768, %s443_s18, [#allocation4], %s413_s27, %s413_s27, %s414_s28  }
  0x24   :  { %s415_s14 = smov [#allocation8]   ;;  %s416_s16 = smov [#allocation9]  }
  0x25   :  { %s51_s15 = sshll.u32 %s415_s14, 4  ;;  %s66_s17 = sshll.u32 %s416_s16, 4  ;;  %s52_s15 = int_to_ptr.vmem [resolvable:$true] %s51_s15  ;;  %s480_s17 = int_to_ptr.vmem [resolvable:$true] %s66_s17 }
  0x26   :  { %s337_s21 = scalar_lea.hbm %s555_s2, 768 }
  0x27   :  { %p338_p2 = scmp.ne.s32.totalorder %s555_s2, %s337_s21  ;;  %p341_p3 = scmp.lt.u32.totalorder %s337_s21, %s555_s2 }
  0x29   :  { %p343_p4 = pnand %p341_p3, %p338_p2 }
  0x2b   :  { %346 = shalt.err (!%p343_p4)
}
  0x2c   :  { %s347_s0 = scalar_lea.vmem %s52_s15, 768  ;;  %p352_p6 = scmp.lt.s32.totalorder %s52_s15, %s52_s15 }
  0x2d   :  { %p348_p5 = scmp.ne.s32.totalorder %s52_s15, %s347_s0  ;;  %p353_p7 = scmp.lt.s32.totalorder %s347_s0, %s347_s0 }
  0x2f   :  { %p354_p8 = por %p353_p7, %p352_p6 }
  0x31   :  { %p355_p9 = pnand %p354_p8, %p348_p5 }
  0x33   :  { %358 = shalt.err (!%p355_p9)
}
  0x34   :  { %57 = dma.hbm_to_vmem [thread:$0]  %s555_s2, 768, %s52_s15, [#allocation7], %s413_s27, %s413_s27, %s414_s28  }
  0x35   :  { %s359_s5 = scalar_lea.hbm %s556_s3, 512 }
  0x36   :  { %p360_p10 = scmp.ne.s32.totalorder %s556_s3, %s359_s5  ;;  %p363_p11 = scmp.lt.u32.totalorder %s359_s5, %s556_s3 }
  0x38   :  { %p365_p12 = pnand %p363_p11, %p360_p10 }
  0x3a   :  { %368 = shalt.err (!%p365_p12)
}
  0x3b   :  { %s369_s10 = scalar_lea.vmem %s480_s17, 512  ;;  %p374_p0 = scmp.lt.s32.totalorder %s480_s17, %s480_s17 }
  0x3c   :  { %p370_p13 = scmp.ne.s32.totalorder %s480_s17, %s369_s10  ;;  %p375_p1 = scmp.lt.s32.totalorder %s369_s10, %s369_s10 }
  0x3e   :  { %p376_p2 = por %p375_p1, %p374_p0 }
  0x40   :  { %p377_p3 = pnand %p376_p2, %p370_p13 }
  0x42   :  { %380 = shalt.err (!%p377_p3)
}
  0x43   :  { %72 = dma.hbm_to_vmem [thread:$0]  %s556_s3, 512, %s480_s17, [#allocation10], %s413_s27, %s413_s27, %s414_s28  }
  0x44   :  { %403 = dma.done.wait [#allocation4], 768  }
  0x45   :  { %404 = vsyncadd [#allocation4], 4294966528 }
  0x46   :  { %405 = dma.done.wait [#allocation7], 1536  }
  0x47   :  { %406 = vsyncadd [#allocation7], 4294965760 }
  0x48   :  { %407 = dma.done.wait [#allocation10], 512  }
  0x49   :  { %408 = vsyncadd [#allocation10], 4294966784  ;;  %v96_v0 = vld [vmem:[#allocation3 + $0x10] sm:$0xff]  ;;  %v97_v3 = vld [vmem:[#allocation3 + $0x18] sm:$0xff]  ;;  %s417_s3 = smov [#allocation11]  }
  0x4a   :  { %v169_v1 = vsub.f32 0.0, %v96_v0  ;;  %v172_v4 = vsub.f32 0.0, %v97_v3  ;;  %v113_v7 = vld [vmem:[#allocation9 + $0x8] sm:$0xff]  ;;  %v115_v8 = vld [vmem:[#allocation9 + $0x18] sm:$0xff]  ;;  %v94_v10 = vld [vmem:[#allocation3] sm:$0xff]  ;;  %s253_s27 = sshll.u32 %s417_s3, 4  ;;  %s254_s27 = int_to_ptr.vmem [resolvable:$true] %s253_s27 }
  0x4b   :  { %v192_v9 = vsub.f32 %v115_v8, %v113_v7  ;;  %v112_v11 = vld [vmem:[#allocation9] sm:$0xff]  ;;  %v114_v12 = vld [vmem:[#allocation9 + $0x10] sm:$0xff]  ;;  %v95_v13 = vld [vmem:[#allocation3 + $0x8] sm:$0xff]  ;;  %s381_s12 = scalar_lea.vmem %s254_s27, 128  ;;  %p386_p5 = scmp.lt.s32.totalorder %s254_s27, %s254_s27 }
  0x4c   :  { %v170_v2 = vmul.f32 1.442695, %v169_v1  ;;  %v173_v5 = vmul.f32 1.442695, %v172_v4  ;;  %v100_v14 = vld [vmem:[#allocation6] sm:$0xff]  ;;  %v101_v15 = vld [vmem:[#allocation6 + $0x8] sm:$0xff]  ;;  %v191_v18 = vsub.f32 %v114_v12, %v112_v11  ;;  %p382_p4 = scmp.ne.s32.totalorder %s254_s27, %s381_s12  ;;  %p387_p6 = scmp.lt.s32.totalorder %s381_s12, %s381_s12 }
  0x4d   :  { %v517_v17 = vld [vmem:[#allocation3 + $0x20] sm:$0xff]  ;;  %v116_v21 = vsub.f32 %v94_v10, %v100_v14  ;;  %v117_v22 = vsub.f32 %v95_v13, %v101_v15  ;;  %v103_v29 = vld [vmem:[#allocation6 + $0x18] sm:$0xff]  ;;  %v523_v36 = vld [vmem:[#allocation6 + $0x20] sm:$0xff] }
  0x4e   :  { %279 = vpow2.f32 %v170_v2  ;;  %v102_v20 = vld [vmem:[#allocation6 + $0x10] sm:$0xff]  ;;  %v202_v24 = vmul.f32 4.0, %v517_v17  ;;  %v521_v35 = vld [vmem:[#allocation3 + $0x28] sm:$0xff]  ;;  %v119_v37 = vsub.f32 %v97_v3, %v103_v29  ;;  %v120_v45 = vsub.f32 %v517_v17, %v523_v36  ;;  %v105_v47 = vld [vmem:[#allocation6 + $0x28] sm:$0xff]  ;;  %p388_p7 = por %p387_p6, %p386_p5 }
  0x4f   :  { %281 = vpow2.f32 %v173_v5  ;;  %v118_v26 = vsub.f32 %v96_v0, %v102_v20  ;;  %v122_v27 = vand.u32 2147483647, %v116_v21  ;;  %v123_v30 = vand.u32 2147483647, %v117_v22  ;;  %v106_v61 = vld [vmem:[#allocation8] sm:$0xff]  ;;  %v107_v62 = vld [vmem:[#allocation8 + $0x8] sm:$0xff] }
  0x50   :  { %v203_v34 = vmul.f32 %v202_v24, %v517_v17  ;;  %v199_v46 = vmul.f32 4.0, %v521_v35  ;;  %v125_v48 = vand.u32 2147483647, %v119_v37  ;;  %v121_v56 = vsub.f32 %v521_v35, %v105_v47  ;;  %p389_p8 = pnand %p388_p7, %p382_p4 }
  0x51   :  { %v124_v38 = vand.u32 2147483647, %v118_v26  ;;  %v134_v39 = vmul.f32 %v122_v27, %v122_v27  ;;  %v135_v41 = vmul.f32 %v123_v30, %v123_v30  ;;  %v264_v53 = vadd.f32 -0.5, %v122_v27  ;;  %v110_v26 = vld [vmem:[#allocation8 + $0x20] sm:$0xff] }
  0x52   :  { %v265_v54 = vadd.f32 -0.5, %v123_v30  ;;  %vm128_vm0 = vcmp.lt.f32.partialorder %v122_v27, 1.0  ;;  %vm129_vm1 = vcmp.lt.f32.partialorder %v123_v30, 1.0  ;;  %v126_v57 = vand.u32 2147483647, %v120_v45 }
  0x53   :  { %v136_v49 = vmul.f32 %v124_v38, %v124_v38  ;;  %v140_v50 = vmul.f32 0.5, %v134_v39  ;;  %v141_v52 = vmul.f32 0.5, %v135_v41  ;;  %v137_v58 = vmul.f32 %v125_v48, %v125_v48  ;;  %v111_v39 = vld [vmem:[#allocation8 + $0x28] sm:$0xff] }
  0x54   :  { %v200_v60 = vmul.f32 %v199_v46, %v521_v35  ;;  %v266_v63 = vadd.f32 -0.5, %v124_v38  ;;  %vm130_vm2 = vcmp.lt.f32.partialorder %v124_v38, 1.0  ;;  %v127_v2 = vand.u32 2147483647, %v121_v56 }
  0x55   :  { %v142_v59 = vmul.f32 0.5, %v136_v49  ;;  %v152_v0 = vsel %vm128_vm0, %v140_v50, %v264_v53  ;;  %v153_v1 = vsel %vm129_vm1, %v141_v52, %v265_v54  ;;  %v138_v3 = vmul.f32 %v126_v57, %v126_v57 }
  0x56   :  { %v158_v4 = vmul.f32 %v152_v0, %v106_v61  ;;  %v159_v5 = vmul.f32 %v153_v1, %v107_v62  ;;  %v143_v7 = vmul.f32 0.5, %v137_v58  ;;  %v267_v8 = vadd.f32 -0.5, %v125_v48 }
  0x57   :  { %vm131_vm3 = vcmp.lt.f32.partialorder %v125_v48, 1.0  ;;  %v139_v12 = vmul.f32 %v127_v2, %v127_v2  ;;  %v187_v15 = vadd.f32 %v107_v62, %v106_v61  ;;  %vm132_vm4 = vcmp.lt.f32.partialorder %v126_v57, 1.0 }
  0x58   :  { %v280_v6 = vpop.eup %279  ;;  %v164_v14 = vadd.f32 %v159_v5, %v158_v4  ;;  %v155_v20 = vsel %vm131_vm3, %v143_v7, %v267_v8  ;;  %vm133_vm5 = vcmp.lt.f32.partialorder %v127_v2, 1.0 }
  0x59   :  { %283 = vrcp.f32 %v280_v6  ;;  %v282_v16 = vpop.eup %281  ;;  %v175_v31 = vmul.f32 %v280_v6, %v116_v21  ;;  %v108_v6 = vld [vmem:[#allocation8 + $0x10] sm:$0xff]  ;;  %v145_v27 = vmul.f32 0.5, %v139_v12 }
  0x5a   :  { %285 = vrcp.f32 %v192_v9  ;;  %v176_v32 = vmul.f32 %v282_v16, %v117_v22  ;;  %v154_v9 = vsel %vm130_vm2, %v142_v59, %v266_v63 }
  0x5b   :  { %v177_v42 = vmul.f32 %v175_v31, %v175_v31  ;;  %v160_v13 = vmul.f32 %v154_v9, %v108_v6  ;;  %v211_v31 = vmul.f32 %v521_v35, %v517_v17 }
  0x5c   :  { %v178_v43 = vmul.f32 %v176_v32, %v176_v32  ;;  %v212_v32 = vmul.f32 %v105_v47, %v523_v36 }
  0x5d   :  { %v165_v24 = vadd.f32 %v164_v14, %v160_v13 }
  0x5e   :  { %v528_v55 = vadd.f32 %v178_v43, %v177_v42  ;;  %v213_v43 = vsub.f32 %v211_v31, %v212_v32 }
  0x60   :  { %vm182_vm6 = vcmp.eq.f32.partialorder %v528_v55, inf  ;;  %v185_v41 = vand.u32 2147483648, %v528_v55  ;;  %vm184_vm7 = vcmp.eq.f32.partialorder %v528_v55, 0.0  ;;  %v214_v47 = vmul.f32 %v213_v43, %v213_v43 }
  0x63   :  { %v284_v19 = vpop.eup %283 }
  0x64   :  { %v196_v23 = vmul.f32 %v284_v19, %v282_v16  ;;  %v286_v25 = vpop.eup %285  ;;  %v109_v16 = vld [vmem:[#allocation8 + $0x18] sm:$0xff]  ;;  %v268_v19 = vadd.f32 -0.5, %v126_v57 }
  0x65   :  { %v194_v28 = vmul.f32 %v286_v25, %v191_v18  ;;  %v144_v18 = vmul.f32 0.5, %v138_v3  ;;  %v188_v25 = vadd.f32 %v187_v15, %v108_v6  ;;  %v218_v38 = vadd.f32 %v109_v16, %v108_v6 }
  0x67   :  { %v197_v33 = vmul.f32 %v196_v23, %v194_v28  ;;  %v161_v23 = vmul.f32 %v155_v20, %v109_v16  ;;  %v269_v28 = vadd.f32 -0.5, %v127_v2  ;;  %v156_v29 = vsel %vm132_vm4, %v144_v18, %v268_v19 }
  0x68   :  { %v189_v37 = vadd.f32 %v188_v25, %v109_v16  ;;  %v219_v48 = vadd.f32 %v218_v38, %v110_v26 }
  0x69   :  { %v198_v40 = vmul.f32 %v197_v33, %v197_v33  ;;  %v162_v33 = vmul.f32 %v156_v29, %v110_v26 }
  0x6a   :  { %v190_v46 = vmul.f32 0.25, %v189_v37 }
  0x6b   :  { %v204_v44 = vmul.f32 %v203_v34, %v198_v40  ;;  %v201_v10 = vadd.f32 %v200_v60, %v198_v40  ;;  %v166_v34 = vadd.f32 %v165_v24, %v161_v23  ;;  %v157_v40 = vsel %vm133_vm5, %v145_v27, %v269_v28 }
  0x6d   :  { %v205_v51 = vadd.f32 1.0, %v204_v44  ;;  %v163_v44 = vmul.f32 %v157_v40, %v111_v39  ;;  %v167_v45 = vadd.f32 %v166_v34, %v162_v33 }
  0x6f   :  { %287 = vrcp.f32 %v205_v51  ;;  %v168_v49 = vadd.f32 %v167_v45, %v163_v44  ;;  %v220_v51 = vadd.f32 %v219_v48, %v111_v39 }
  0x70   :  { %289 = vrsqrt.f32 %v528_v55 }
  0x71   :  { %v221_v56 = vmul.f32 0.25, %v220_v51  ;;  %v223_v57 = vmul.f32 0.0010416667, %v168_v49 }
  0x79   :  { %v288_v11 = vpop.eup %287 }
  0x7a   :  { %v207_v21 = vmul.f32 %v288_v11, %v201_v10  ;;  %v290_v22 = vpop.eup %289 }
  0x7b   :  { %v181_v30 = vmul.f32 %v290_v22, %v528_v55 }
  0x7c   :  { %291 = vlog2.f32 %v207_v21 }
  0x7d   :  { %v183_v42 = vsel %vm182_vm6, %v528_v55, %v181_v30 }
  0x7e   :  { %v186_v35 = vsel %vm184_vm7, %v185_v41, %v183_v42 }
  0x7f   :  { %v224_v52 = vmul.f32 %v190_v46, %v186_v35 }
  0x81   :  { %v225_v58 = vmul.f32 0.00078125, %v224_v52 }
  0x83   :  { %v226_v55 = vadd.f32 %v225_v58, %v223_v57 }
  0x86   :  { %v292_v17 = vpop.eup %291 }
  0x87   :  { %v209_v36 = vmul.f32 0.6931472, %v292_v17 }
  0x89   :  { %v210_v50 = vmul.f32 0.5, %v209_v36 }
  0x8b   :  { %v215_v53 = vmul.f32 %v210_v50, %v210_v50 }
  0x8d   :  { %v216_v54 = vadd.f32 %v215_v53, %v214_v47 }
  0x8f   :  { %v217_v59 = vmul.f32 0.5, %v216_v54 }
  0x91   :  { %v227_v60 = vmul.f32 %v221_v56, %v217_v59 }
  0x93   :  { %v228_v61 = vmul.f32 0.00078125, %v227_v60 }
  0x95   :  { %v229_v62 = vadd.f32 %v228_v61, %v226_v55 }
  0x97   :  { %236 = vadd.xlane.f32.xlu0 %v229_v62 }
 0x124   :  { %v237_v63 = vpop.xlane.xlu0 %236 }
 0x125   :  { %v238_v0 = vrot.slane %v237_v63, 4 }
 0x127   :  { %v239_v1 = vadd.f32 %v238_v0, %v237_v63 }
 0x129   :  { %v240_v2 = vrot.slane %v239_v1, 2 }
 0x12b   :  { %v241_v3 = vadd.f32 %v240_v2, %v239_v1 }
 0x12d   :  { %v242_v4 = vrot.slane %v241_v3, 1 }
 0x12f   :  { %v243_v5 = vadd.f32 %v242_v4, %v241_v3 }
 0x131   :  { %270 = vpush %v243_v5 }
 0x162   :  { %s271_s28 = spop %270 }
 0x163   :  { %v245_v6 = vstv %s271_s28 }
 0x164   :  { %246 = vst [vmem:[#allocation11] sm:$0xff] %v245_v6 }
 0x165   :  { %392 = shalt.err (!%p389_p8)
}
 0x166   :  { %s393_s14 = scalar_lea.hbm %s557_s4, 128 }
 0x167   :  { %p394_p9 = scmp.ne.s32.totalorder %s557_s4, %s393_s14  ;;  %p397_p10 = scmp.lt.u32.totalorder %s393_s14, %s557_s4 }
 0x169   :  { %p399_p11 = pnand %p397_p10, %p394_p9 }
 0x16b   :  { %402 = shalt.err (!%p399_p11)
}
 0x16c   :  { %256 = dma.vmem_to_hbm [thread:$0]  %s254_s27, 128, %s557_s4, [#allocation5]  }
 0x16d   :  { %409 = dma.done.wait [#allocation5], 128  }
 0x16e   :  { %410 = vsyncadd [#allocation5], 4294967168 }
 0x16f   :  { %260 = vsyncpa [#allocation4], 1 }
 0x170   :  { %261 = vsyncpa [#allocation7], 1 }
 0x171   :  { %262 = vsyncpa [#allocation10], 1 }
 0x172   :  { %263 = vsyncpa [#allocation5], 1 }

</bundles_post_ra>
